<compile_context>
chip_gen: v7x
topology: tpu7x:2x2x1
jax: 0.10.0
libtpu: 0.0.40
codegen_flags: <defaults>
</compile_context>

<pallas_src>
import jax
import jax.numpy as jnp
from jax.experimental import pallas as pl
from jax.experimental.pallas import tpu as pltpu


def _round_up(n, m):
    return ((n + m - 1) // m) * m


def _scaled_silu_kernel(x_ref, inv_s_ref, o_ref):
    # x_ref: (tm, tn) activation tile; inv_s_ref: (1, tn) f32 row of 1/scales.
    # Math in f32; SiLU via tanh -> single EUP op per element.
    x = x_ref[...].astype(jnp.float32)
    act = x * (0.5 * jnp.tanh(0.5 * x) + 0.5)           # x * sigmoid(x)
    o_ref[...] = (act * inv_s_ref[...]).astype(o_ref.dtype)


def _tile_budget_bytes():
    # Budget for the double-buffered (in + out) activation tiles:
    # ~1/4 of physical VMEM (16 MiB on v7x's 64 MiB, 32 MiB on v5e/v6e's 128).
    try:
        vmem = pltpu.get_tpu_info().vmem_capacity_bytes
    except Exception:
        vmem = 64 * 1024 * 1024                          # conservative (v7x)
    return min(32 * 1024 * 1024, max(8 * 1024 * 1024, vmem // 4))


def scaled_activation(x, scales, *, tile_cols=2048, tile_budget_bytes=None):
    """ScaledActivation forward: SiLU(x) / scales.reshape(1, 1, -1).

    x: (B, S, H); scales: (H,). Scales are assumed strictly positive
    (AWQ/QServe convention); a zero scale yields inf/nan like the torch divide.
    """
    B, S, H = x.shape
    rows = B * S
    x2d = x.reshape(rows, H)
    itemsize = jnp.dtype(x.dtype).itemsize

    # Precompute 1/scales once, kept in float32 (no bf16 rounding of scales).
    inv2d = (1.0 / scales.astype(jnp.float32)).reshape(1, H)

    if tile_budget_bytes is None:
        tile_budget_bytes = _tile_budget_bytes()
    rows_aligned = _round_up(rows, 8)

    # Preferred: full-width (tm, H) tiles, 1-D grid over rows. Fall back to
    # 2-D column tiling only when a reasonable full-width row tile (>=128
    # rows, or the whole tensor) does not fit the budget.
    full_tm = (tile_budget_bytes // (4 * H * itemsize)) // 8 * 8
    use_full_width = full_tm >= min(128, rows_aligned)

    if use_full_width:
        tm = max(8, min(full_tm, rows_aligned, 2048))
        tn = H                            # equals full array dim -> always legal
        grid = (pl.cdiv(rows, tm),)
        in_specs = [
            pl.BlockSpec((tm, tn), lambda i: (i, 0)),
            pl.BlockSpec((1, tn), lambda i: (0, 0)),     # resident across grid
        ]
        out_specs = pl.BlockSpec((tm, tn), lambda i: (i, 0))
        dims = ("parallel",)
    else:
        tn = min(_round_up(tile_cols, 128), _round_up(H, 128))
        tm = max(8, (tile_budget_bytes // (4 * tn * itemsize)) // 8 * 8)
        tm = min(tm, rows_aligned, 2048)
        # Row axis outermost so the v7x megacore split lands on the long row
        # axis; the tiny (1, tn) inv-scales re-fetch per inner step is noise.
        grid = (pl.cdiv(rows, tm), pl.cdiv(H, tn))
        in_specs = [
            pl.BlockSpec((tm, tn), lambda i, j: (i, j)),
            pl.BlockSpec((1, tn), lambda i, j: (0, j)),
        ]
        out_specs = pl.BlockSpec((tm, tn), lambda i, j: (i, j))
        dims = ("parallel", "parallel")

    # VMEM limit derived from the actual footprint (double-buffered in + out
    # tiles + inv row) plus slack for compiler-internal scratch.
    tile_bytes = tm * tn * itemsize
    vmem_limit = 2 * 2 * tile_bytes + 2 * tn * 4 + 4 * 1024 * 1024
    vmem_limit = min(_round_up(vmem_limit, 1024 * 1024), 64 * 1024 * 1024)

    # No padding/slicing round-trips: ragged edge blocks use OOB-padded reads
    # and masked stores. SiLU on pad lanes is discarded by the masked store;
    # there is no in-tile reduction, so this is safe.
    out2d = pl.pallas_call(
        _scaled_silu_kernel,
        out_shape=jax.ShapeDtypeStruct((rows, H), x.dtype),
        grid_spec=pl.GridSpec(
            grid=grid,
            in_specs=in_specs,
            out_specs=out_specs,
        ),
        compiler_params=pltpu.CompilerParams(
            dimension_semantics=dims,
            vmem_limit_bytes=vmem_limit,
        ),
    )(x2d, inv2d)

    return out2d.reshape(B, S, H)


if __name__ == "__main__":
    key = jax.random.PRNGKey(0)
    kx, ks = jax.random.split(key)

    # Small shape consistent with the module: (B, S, H) + per-channel scales.
    B, S, H = 2, 8, 32
    x = jax.random.normal(kx, (B, S, H), dtype=jnp.float32)
    # Deterministic, strictly-positive scales (as AWQ/QServe scales are).
    scales = 0.5 + jax.random.uniform(ks, (H,), dtype=jnp.float32)

    out = scaled_activation(x, scales)
    jax.block_until_ready(out)
    ref = jax.nn.silu(x) / scales.reshape(1, 1, -1)
    assert jnp.allclose(out, ref, atol=2e-5, rtol=1e-5), "mismatch vs reference"

    # Second check: ragged rows + H not a multiple of 128, with a tiny forced
    # tile budget to exercise the 2-D fallback path and edge masking on both
    # axes (no wrapper padding anywhere).
    kx2, ks2 = jax.random.split(jax.random.PRNGKey(1))
    B2, S2, H2 = 3, 5, 200
    x2 = jax.random.normal(kx2, (B2, S2, H2), dtype=jnp.float32)
    scales2 = 0.5 + jax.random.uniform(ks2, (H2,), dtype=jnp.float32)
    out2 = scaled_activation(x2, scales2, tile_cols=128,
                             tile_budget_bytes=32 * 1024)
    jax.block_until_ready(out2)
    ref2 = jax.nn.silu(x2) / scales2.reshape(1, 1, -1)
    assert jnp.allclose(out2, ref2, atol=2e-5, rtol=1e-5), "mismatch (ragged case)"

    # Third check: bf16 activations (f32 math in-kernel, bf16 output cast).
    x3 = jax.random.normal(kx, (2, 8, 256), dtype=jnp.bfloat16)
    scales3 = 0.5 + jax.random.uniform(ks, (256,), dtype=jnp.float32)
    out3 = scaled_activation(x3, scales3)
    jax.block_until_ready(out3)
    ref3 = (jax.nn.silu(x3.astype(jnp.float32))
            / scales3.reshape(1, 1, -1)).astype(jnp.bfloat16)
    assert jnp.allclose(out3.astype(jnp.float32), ref3.astype(jnp.float32),
                        atol=2e-2, rtol=2e-2), "mismatch (bf16 case)"

    # TODO(synk): ScaledActivation wraps an arbitrary activation module; only
    # SiLU (the common QServe/AWQ case) is implemented here.
    print("KERNEL_OK")
</pallas_src>

<mosaic_0001>
module attributes {stable_mosaic.version = 11 : i64} {
  func.func @_scaled_silu_kernel(%arg0: i32, %arg1: memref<16x32xf32, #tpu.memory_space<vmem>>, %arg2: memref<1x32xf32, #tpu.memory_space<vmem>>, %arg3: memref<16x32xf32, #tpu.memory_space<vmem>>) attributes {dimension_semantics = [#tpu.dimension_semantics<parallel>], iteration_bounds = array<i64: 1>, scalar_prefetch = 0 : i64, scratch_operands = 0 : i64, tpu.core_type = #tpu.core_type<tc>, window_params = [{transform_indices = @transform_0, window_bounds = array<i64: 16, 32>}, {pipeline_mode = #tpu.pipeline_mode<synchronous>, transform_indices = @transform_1, window_bounds = array<i64: 1, 32>}, {transform_indices = @transform_2, window_bounds = array<i64: 16, 32>}]} {
    %c0 = arith.constant 0 : index
    %c0_0 = arith.constant 0 : index
    %0 = vector.load %arg1[%c0, %c0_0] : memref<16x32xf32, #tpu.memory_space<vmem>>, vector<16x32xf32>
    %cst = arith.constant 5.000000e-01 : f32
    %1 = vector.broadcast %cst : f32 to vector<16x32xf32>
    %2 = arith.mulf %1, %0 : vector<16x32xf32>
    %3 = math.tanh %2 : vector<16x32xf32>
    %cst_1 = arith.constant 5.000000e-01 : f32
    %4 = vector.broadcast %cst_1 : f32 to vector<16x32xf32>
    %5 = arith.mulf %4, %3 : vector<16x32xf32>
    %cst_2 = arith.constant 5.000000e-01 : f32
    %6 = vector.broadcast %cst_2 : f32 to vector<16x32xf32>
    %7 = arith.addf %5, %6 : vector<16x32xf32>
    %8 = arith.mulf %0, %7 : vector<16x32xf32>
    %c0_3 = arith.constant 0 : index
    %c0_4 = arith.constant 0 : index
    %9 = vector.load %arg2[%c0_3, %c0_4] : memref<1x32xf32, #tpu.memory_space<vmem>>, vector<1x32xf32>
    %10 = vector.broadcast %9 : vector<1x32xf32> to vector<16x32xf32>
    %11 = arith.mulf %8, %10 : vector<16x32xf32>
    %c0_5 = arith.constant 0 : index
    %c0_6 = arith.constant 0 : index
    %12 = vector.load %arg3[%c0_5, %c0_6] : memref<16x32xf32, #tpu.memory_space<vmem>>, vector<16x32xf32>
    tpu.vector_store %arg3[%c0_5, %c0_6], %11 {strides = array<i32>} : memref<16x32xf32, #tpu.memory_space<vmem>>, vector<16x32xf32>,
    return
  }
  func.func @transform_0(%arg0: i32) -> (i32, i32) {
    %c0_i32 = arith.constant 0 : i32
    %c0_i32_0 = arith.constant 0 : i32
    return %arg0, %c0_i32 : i32, i32
  }
  func.func @transform_1(%arg0: i32) -> (i32, i32) {
    %c0_i32 = arith.constant 0 : i32
    %c0_i32_0 = arith.constant 0 : i32
    %c0_i32_1 = arith.constant 0 : i32
    return %c0_i32, %c0_i32_0 : i32, i32
  }
  func.func @transform_2(%arg0: i32) -> (i32, i32) {
    %c0_i32 = arith.constant 0 : i32
    %c0_i32_0 = arith.constant 0 : i32
    return %arg0, %c0_i32 : i32, i32
  }
}

</mosaic_0001>

<bundles_post_ra>
// kernel: tpu_custom_call.1
= control target key start
LH: loop header
LB: loop body
LE: loop exit
PB: predicated region body
PF: predicated region fallthrough
CT: control target
= control target key end

     0   :  { %7 = vsyncpa [#allocation3], 0  ;;  %s176_s0 = inlined_call_operand.hbm [shape: f32[16,32], index: 0, kind: input, shape index: {}]   ;;  %s177_s1 = inlined_call_operand.vmem [shape: f32[1,32], index: 1, kind: input, shape index: {}]   ;;  %s178_s2 = inlined_call_operand.hbm [shape: f32[16,32], index: 2, kind: output, shape index: {}]  }
   0x1   :  { %8 = vsyncpa [#allocation4], 0  ;;  %s124_s9 = smov [#allocation2]   ;;  %s76_s13 = scalar_lea.hbm %s176_s0, 256 }
   0x2   :  { %s14_s10 = sshll.u32 %s124_s9, 4  ;;  %p77_p0 = scmp.ne.s32.totalorder %s176_s0, %s76_s13  ;;  %s15_s10 = int_to_ptr.vmem [resolvable:$true] %s14_s10 }
   0x3   :  { %p80_p1 = scmp.lt.u32.totalorder %s76_s13, %s176_s0 }
   0x5   :  { %p82_p2 = pnand %p80_p1, %p77_p0 }
   0x7   :  { %85 = shalt.err (!%p82_p2)
}
   0x8   :  { %s86_s18 = scalar_lea.vmem %s15_s10, 256  ;;  %p91_p4 = scmp.lt.s32.totalorder %s15_s10, %s15_s10 }
   0x9   :  { %p87_p3 = scmp.ne.s32.totalorder %s15_s10, %s86_s18  ;;  %p92_p5 = scmp.lt.s32.totalorder %s86_s18, %s86_s18 }
   0xb   :  { %p93_p6 = por %p92_p5, %p91_p4 }
   0xd   :  { %p94_p7 = pnand %p93_p6, %p87_p3 }
   0xf   :  { %97 = shalt.err (!%p94_p7)
}
  0x10   :  { %s125_s19 = smov 128   ;;  %s126_s20 = smov 8  }
  0x11   :  { %20 = dma.hbm_to_vmem [thread:$0]  %s176_s0, 256, %s15_s10, [#allocation3], %s125_s19, %s125_s19, %s126_s20  }
  0x12   :  { %120 = dma.done.wait [#allocation3], 256  }
  0x13   :  { %121 = vsyncadd [#allocation3], 4294967040  ;;  %v26_v0 = vld [vmem:[#allocation2] sm:$0xff]  ;;  %v27_v1 = vld [vmem:[#allocation2 + $0x8] sm:$0xff]  ;;  %s127_s0 = smov [#allocation5]   ;;  %vm47_vm0 = vcmask 261120  }
  0x14   :  { %v28_v2 = vmul.f32 0.5, %v26_v0  ;;  %v29_v3 = vmul.f32 0.5, %v27_v1  ;;  %v67_v9 = vld [vmem:[%s177_s1] ss:$0 sm:$0xff]  ;;  %s55_s25 = sshll.u32 %s127_s0, 4  ;;  %s56_s25 = int_to_ptr.vmem [resolvable:$true] %s55_s25 }
  0x15   :  { %s98_s26 = scalar_lea.vmem %s56_s25, 256  ;;  %p103_p9 = scmp.lt.s32.totalorder %s56_s25, %s56_s25 }
  0x16   :  { %72 = vtanh.f32 %v28_v2  ;;  %p99_p8 = scmp.ne.s32.totalorder %s56_s25, %s98_s26  ;;  %p104_p10 = scmp.lt.s32.totalorder %s98_s26, %s98_s26 }
  0x17   :  { %74 = vtanh.f32 %v29_v3 }
  0x18   :  { %p105_p11 = por %p104_p10, %p103_p9 }
  0x1a   :  { %p106_p12 = pnand %p105_p11, %p99_p8 }
  0x20   :  { %v73_v4 = vpop.eup %72 }
  0x21   :  { %v75_v5 = vpop.eup %74  ;;  %v32_v6 = vmul.f32 0.5, %v73_v4 }
  0x22   :  { %v33_v7 = vmul.f32 0.5, %v75_v5 }
  0x23   :  { %v34_v8 = vadd.f32 0.5, %v32_v6 }
  0x24   :  { %v35_v10 = vadd.f32 0.5, %v33_v7 }
  0x25   :  { %v36_v11 = vmul.f32 %v34_v8, %v26_v0 }
  0x26   :  { %v37_v12 = vmul.f32 %v35_v10, %v27_v1 }
  0x27   :  { %v45_v13 = vmul.f32 %v67_v9, %v36_v11 }
  0x28   :  { %v46_v14 = vmul.f32 %v67_v9, %v37_v12 }
  0x29   :  { %48 = vst.msk [vmem:[#allocation5] sm:$0xff] %vm47_vm0, %v45_v13 }
  0x2a   :  { %49 = vst.msk [vmem:[#allocation5 + $0x8] sm:$0xff] %vm47_vm0, %v46_v14 }
  0x2b   :  { %109 = shalt.err (!%p106_p12)
}
  0x2c   :  { %s110_s28 = scalar_lea.hbm %s178_s2, 256 }
  0x2d   :  { %p111_p13 = scmp.ne.s32.totalorder %s178_s2, %s110_s28  ;;  %p114_p0 = scmp.lt.u32.totalorder %s110_s28, %s178_s2 }
  0x2f   :  { %p116_p1 = pnand %p114_p0, %p111_p13 }
  0x31   :  { %119 = shalt.err (!%p116_p1)
}
  0x32   :  { %61 = dma.vmem_to_hbm [thread:$0]  %s56_s25, 256, %s178_s2, [#allocation4], %s125_s19, %s125_s19, %s126_s20  }
  0x33   :  { %122 = dma.done.wait [#allocation4], 256  }
  0x34   :  { %123 = vsyncadd [#allocation4], 4294967040 }
  0x35   :  { %65 = vsyncpa [#allocation3], 1 }
  0x36   :  { %66 = vsyncpa [#allocation4], 1 }

</bundles_post_ra>
